<compile_context>
chip_gen: v7x
topology: tpu7x:2x2x1
jax: 0.10.0
libtpu: 0.0.40
codegen_flags: <defaults>
</compile_context>

<pallas_src>
import functools
import math

import numpy as np

import jax
import jax.numpy as jnp
from jax.experimental import pallas as pl
from jax.experimental.pallas import tpu as pltpu


def _round_up(n, m):
    return ((n + m - 1) // m) * m


def _psd_kernel(meanproj_ref, x_ref, basis_ref, o_ref, acc_ref):
    # meanproj_ref : VMEM (1, 2*Fp)  f32, mean * column-sum of basis (rank-1 mean fix)
    # x_ref        : VMEM (TB, TK)   signal tile (compute dtype)
    # basis_ref    : VMEM (TK, 2*Fp) [cos | sin] DFT basis tile (1/Lp scaled)
    # o_ref        : VMEM (TB, Fp)   normalized PSD tile (f32; padded columns stay 0)
    # acc_ref      : VMEM (TB, 2*Fp) f32 matmul accumulator (resident across K axis)
    k = pl.program_id(1)

    @pl.when(k == 0)
    def _():
        acc_ref[...] = jnp.zeros_like(acc_ref)

    acc_ref[...] += jnp.dot(x_ref[...], basis_ref[...],
                            preferred_element_type=jnp.float32)

    @pl.when(k == pl.num_programs(1) - 1)
    def _():
        f_pad = o_ref.shape[-1]
        # Rank-1 global-mean correction applied post-accumulation in f32:
        #   (x - mean) @ basis == x @ basis - mean * colsum(basis)
        re_im = acc_ref[...] - meanproj_ref[...]
        re = re_im[:, :f_pad]
        im = re_im[:, f_pad:]
        psd = re * re + im * im                       # padded frequency columns stay 0
        denom = jnp.sum(psd, axis=-1, keepdims=True)
        denom = jnp.maximum(denom, jnp.float32(1e-30))  # padded batch rows -> 0, not NaN
        r = pl.reciprocal(denom, approx=True)           # EUP slot (free here)
        r = r * (2.0 - denom * r)                       # one Newton step -> ~f32 exact
        o_ref[...] = (psd * r).astype(o_ref.dtype)


@functools.lru_cache(maxsize=16)
def _dft_basis(L, pad, Lp, L_pad, F_pad, dtype_name):
    """[cos | sin] rDFT basis (forward norm 1/Lp). Rows are the L real signal
    positions shifted by the zero pad; rows beyond L (K-tiling pad) and
    frequency columns beyond F (lane padding to a multiple of 128) are zero.
    Also returns the f64-accurate column sums of the *cast* basis, used for
    the rank-1 mean correction."""
    F = Lp // 2 + 1
    n = np.arange(L, dtype=np.float64)[:, None] + float(pad)
    k = np.arange(F, dtype=np.float64)[None, :]
    ang = (2.0 * math.pi / Lp) * n * k
    basis = np.zeros((L_pad, 2 * F_pad), dtype=np.float64)
    basis[:L, :F] = np.cos(ang) / Lp
    basis[:L, F_pad:F_pad + F] = np.sin(ang) / Lp     # sign irrelevant (squared)
    basis_cast = basis.astype(jnp.dtype(dtype_name))
    colsum = basis_cast.astype(np.float64).sum(axis=0).astype(np.float32)
    return jnp.asarray(basis_cast), jnp.asarray(colsum[None, :])


def _tpu_vmem_budget():
    try:
        info = pltpu.get_tpu_info()
        cap = int(getattr(info, "vmem_capacity_bytes", 0)) or (64 << 20)
    except Exception:
        cap = 64 << 20                    # conservative default (v7x per-TC)
    return min(cap * 3 // 4, 96 << 20)    # ~48 MiB on v7x, 96 MiB on v5e/v6e


def _vmem_need(tb, tk, ktiles, f_pad, itemsize):
    basis_bufs = 1 if ktiles == 1 else 2  # constant-index basis is single-buffered
    return (2 * tb * tk * itemsize        # x tiles (double-buffered)
            + basis_bufs * tk * 2 * f_pad * itemsize
            + 2 * tb * f_pad * 4          # out tiles (double-buffered, f32)
            + tb * 2 * f_pad * 4          # f32 accumulator scratch
            + 2 * tb * 2 * f_pad * 4      # live f32 epilogue intermediates
            + 2 * f_pad * 4               # mean-correction row
            + (2 << 20))                  # slack


def calculate_norm_psd(x, zero_pad=0, *, compute_dtype=jnp.float32,
                       batch_tile=None, k_tile=None):
    """x: (B, L) float. Returns (B, F) normalized PSD, F = Lp//2 + 1.
    Matches CalculateNormPSD.forward (Fs/high_pass/low_pass are unused there).
    compute_dtype=jnp.bfloat16 gives the MXU-native path (~1e-2 accuracy)."""
    B, L = x.shape
    pad = int(zero_pad / 2 * L)
    Lp = L + 2 * pad
    F = Lp // 2 + 1
    F_pad = _round_up(F, 128)
    itemsize = jnp.dtype(compute_dtype).itemsize
    budget = _tpu_vmem_budget()

    # ---- batch tile: large enough to amortize per-grid-step overhead, and
    # >=2 batch steps when the batch allows it (v7x megacore sharding).
    B8 = _round_up(B, 8)
    if batch_tile is None:
        TB = min(512, B8)
        if B8 >= 16 and B8 // TB < 2:
            TB = max(8, _round_up((B8 + 1) // 2, 8))
    else:
        TB = max(8, _round_up(min(int(batch_tile), B8), 8))

    # ---- K tile: resident basis when it fits the per-generation VMEM budget,
    # otherwise tile the reduction axis (grid axis 1, "arbitrary").
    def pick_tk(tb):
        if _vmem_need(tb, L, 1, F_pad, itemsize) <= budget:
            return L, 1
        tk = 2048
        while tk >= 128:
            kt = _round_up(L, tk) // tk
            if kt > 1 and _vmem_need(tb, tk, kt, F_pad, itemsize) <= budget:
                return tk, kt
            tk //= 2
        return 128, _round_up(L, 128) // 128

    if k_tile is not None:
        TK = max(128, _round_up(int(k_tile), 128))
        if TK >= L:
            TK, K_tiles = L, 1
        else:
            K_tiles = _round_up(L, TK) // TK
    else:
        TK, K_tiles = pick_tk(TB)
        while _vmem_need(TB, TK, K_tiles, F_pad, itemsize) > budget and TB > 8:
            TB = max(8, _round_up(TB // 2, 8))
            TK, K_tiles = pick_tk(TB)

    est_vmem = _vmem_need(TB, TK, K_tiles, F_pad, itemsize)
    # Raise the scoped limit whenever we exceed v5e's 16 MiB default; never
    # request more than the per-generation physical budget (48 MiB on v7x).
    vmem_limit = (None if est_vmem <= (16 << 20)
                  else int(min(max(est_vmem, 32 << 20), budget)))

    L_pad = TK * K_tiles
    B_pad = _round_up(B, TB)

    basis, colsum = _dft_basis(L, pad, Lp, L_pad, F_pad,
                               jnp.dtype(compute_dtype).name)

    # Global mean over ALL elements (must NOT be per-tile).  Applied inside
    # the kernel as a rank-1 post-matmul correction: mean * colsum(basis).
    mean = jnp.mean(x.astype(jnp.float32))
    meanproj = (mean * colsum).astype(jnp.float32)        # (1, 2*F_pad) f32

    xc = x.astype(compute_dtype)
    if B_pad != B or L_pad != L:
        xc = jnp.pad(xc, ((0, B_pad - B), (0, L_pad - L)))

    grid = (B_pad // TB, K_tiles)

    if K_tiles == 1:
        basis_spec = pl.BlockSpec((L_pad, 2 * F_pad), lambda i, k: (0, 0),
                                  pipeline_mode=pl.Buffered(1))
    else:
        basis_spec = pl.BlockSpec((TK, 2 * F_pad), lambda i, k: (k, 0))
    meanproj_spec = pl.BlockSpec((1, 2 * F_pad), lambda i, k: (0, 0),
                                 pipeline_mode=pl.Buffered(1))

    cost = pl.CostEstimate(
        flops=int(2 * B_pad * L_pad * 2 * F_pad + 6 * B_pad * F_pad),
        transcendentals=int(B_pad),
        bytes_accessed=int(xc.size * itemsize + basis.size * itemsize
                           + B_pad * F_pad * 4 + meanproj.size * 4),
    )

    out = pl.pallas_call(
        _psd_kernel,
        out_shape=jax.ShapeDtypeStruct((B_pad, F_pad), jnp.float32),
        grid=grid,
        in_specs=[
            meanproj_spec,                                    # mean correction row
            pl.BlockSpec((TB, TK), lambda i, k: (i, k)),      # x batch/K tile
            basis_spec,                                       # [cos|sin] basis tile
        ],
        out_specs=pl.BlockSpec((TB, F_pad), lambda i, k: (i, 0)),
        scratch_shapes=[pltpu.VMEM((TB, 2 * F_pad), jnp.float32)],
        compiler_params=pltpu.CompilerParams(
            dimension_semantics=("parallel", "arbitrary"),
            vmem_limit_bytes=vmem_limit),
        cost_estimate=cost,
    )(meanproj, xc, basis)

    return out[:B, :F]


def _reference(x, zero_pad=0):
    """Pure-JAX reference matching the PyTorch module."""
    x = x - jnp.mean(x)
    L = x.shape[-1]
    if zero_pad > 0:
        p = int(zero_pad / 2 * L)
        x = jnp.pad(x, ((0, 0), (p, p)))
    X = jnp.fft.rfft(x, axis=-1) / x.shape[-1]      # norm='forward'
    psd = jnp.real(X) ** 2 + jnp.imag(X) ** 2
    return psd / jnp.sum(psd, axis=-1, keepdims=True)


if __name__ == "__main__":
    # Fs / high_pass / low_pass are unused in forward() — omitted.
    key = jax.random.PRNGKey(0)
    B, L = 4, 128                       # small signal batch, e.g. rPPG traces
    x = jax.random.normal(key, (B, L), dtype=jnp.float32)

    # f32 path, no zero padding, resident-basis (K_tiles == 1) path.
    out = jax.block_until_ready(calculate_norm_psd(x, zero_pad=0))
    ref = _reference(x, zero_pad=0)
    assert out.shape == (B, L // 2 + 1)
    assert jnp.allclose(out, ref, atol=1e-5, rtol=1e-4), (
        float(jnp.max(jnp.abs(out - ref))))

    # f32 path with zero padding (exercises the shifted-phase basis).
    out_p = jax.block_until_ready(calculate_norm_psd(x, zero_pad=1))
    ref_p = _reference(x, zero_pad=1)
    Lp = L + 2 * int(1 / 2 * L)
    assert out_p.shape == (B, Lp // 2 + 1)
    assert jnp.allclose(out_p, ref_p, atol=1e-5, rtol=1e-4), (
        float(jnp.max(jnp.abs(out_p - ref_p))))

    # K-tiled accumulator path (forced small k_tile so K_tiles > 1).
    x2 = jax.random.normal(jax.random.PRNGKey(1), (4, 256), dtype=jnp.float32)
    out_k = jax.block_until_ready(calculate_norm_psd(x2, zero_pad=0, k_tile=128))
    ref_k = _reference(x2, zero_pad=0)
    assert out_k.shape == (4, 256 // 2 + 1)
    assert jnp.allclose(out_k, ref_k, atol=1e-5, rtol=1e-4), (
        float(jnp.max(jnp.abs(out_k - ref_k))))

    # bf16 compute path (MXU-native); loose sanity tolerance.
    out_bf = jax.block_until_ready(
        calculate_norm_psd(x, zero_pad=0, compute_dtype=jnp.bfloat16))
    assert out_bf.shape == (B, L // 2 + 1)
    assert jnp.allclose(out_bf, ref, atol=1e-2, rtol=1e-1), (
        float(jnp.max(jnp.abs(out_bf - ref))))

    print("KERNEL_OK")
</pallas_src>

<mosaic_0001>
module attributes {stable_mosaic.version = 11 : i64} {
  func.func @_psd_kernel(%arg0: i32, %arg1: i32, %arg2: memref<1x256xf32, #tpu.memory_space<vmem>>, %arg3: memref<8x128xf32, #tpu.memory_space<vmem>>, %arg4: memref<128x256xf32, #tpu.memory_space<vmem>>, %arg5: memref<8x128xf32, #tpu.memory_space<vmem>>, %arg6: memref<8x256xf32, #tpu.memory_space<vmem>>) attributes {dimension_semantics = [#tpu.dimension_semantics<parallel>, #tpu.dimension_semantics<arbitrary>], iteration_bounds = array<i64: 1, 1>, scalar_prefetch = 0 : i64, scratch_operands = 1 : i64, tpu.core_type = #tpu.core_type<tc>, window_params = [{pipeline_mode = #tpu.pipeline_mode<synchronous>, transform_indices = @transform_0, window_bounds = array<i64: 1, 256>}, {transform_indices = @transform_1, window_bounds = array<i64: 8, 128>}, {pipeline_mode = #tpu.pipeline_mode<synchronous>, transform_indices = @transform_2, window_bounds = array<i64: 128, 256>}, {transform_indices = @transform_3, window_bounds = array<i64: 8, 128>}]} {
    %c0_i32 = arith.constant 0 : i32
    %0 = arith.cmpi eq, %arg1, %c0_i32 : i32
    %1 = arith.extui %0 : i1 to i32
    %c0_i32_0 = arith.constant 0 : i32
    %2 = arith.cmpi ne, %1, %c0_i32_0 : i32
    scf.if %2 {
      %cst_10 = arith.constant 0.000000e+00 : f32
      %12 = vector.broadcast %cst_10 : f32 to vector<8x256xf32>
      %c0_11 = arith.constant 0 : index
      %c0_12 = arith.constant 0 : index
      %13 = vector.load %arg6[%c0_11, %c0_12] : memref<8x256xf32, #tpu.memory_space<vmem>>, vector<8x256xf32>
      tpu.vector_store %arg6[%c0_11, %c0_12], %12 {strides = array<i32>} : memref<8x256xf32, #tpu.memory_space<vmem>>, vector<8x256xf32>,
    } else {
    }
    %c0 = arith.constant 0 : index
    %c0_1 = arith.constant 0 : index
    %3 = vector.load %arg6[%c0, %c0_1] : memref<8x256xf32, #tpu.memory_space<vmem>>, vector<8x256xf32>
    %c0_2 = arith.constant 0 : index
    %c0_3 = arith.constant 0 : index
    %4 = vector.load %arg3[%c0_2, %c0_3] : memref<8x128xf32, #tpu.memory_space<vmem>>, vector<8x128xf32>
    %c0_4 = arith.constant 0 : index
    %c0_5 = arith.constant 0 : index
    %5 = vector.load %arg4[%c0_4, %c0_5] : memref<128x256xf32, #tpu.memory_space<vmem>>, vector<128x256xf32>
    %cst = arith.constant dense<0.000000e+00> : vector<8x256xf32>
    %6 = tpu.matmul %4, %5, %cst {dimension_numbers = #tpu.dot_dimension_numbers<[1], [0], [0], [1], [0, 0, 1, 1], [], []>} : vector<8x128xf32>, vector<128x256xf32>, vector<8x256xf32> -> vector<8x256xf32>
    %7 = arith.addf %3, %6 : vector<8x256xf32>
    %c0_6 = arith.constant 0 : index
    %c0_7 = arith.constant 0 : index
    %8 = vector.load %arg6[%c0_6, %c0_7] : memref<8x256xf32, #tpu.memory_space<vmem>>, vector<8x256xf32>
    tpu.vector_store %arg6[%c0_6, %c0_7], %7 {strides = array<i32>} : memref<8x256xf32, #tpu.memory_space<vmem>>, vector<8x256xf32>,
    %c0_i32_8 = arith.constant 0 : i32
    %9 = arith.cmpi eq, %arg1, %c0_i32_8 : i32
    %10 = arith.extui %9 : i1 to i32
    %c0_i32_9 = arith.constant 0 : i32
    %11 = arith.cmpi ne, %10, %c0_i32_9 : i32
    scf.if %11 {
      %c0_10 = arith.constant 0 : index
      %c0_11 = arith.constant 0 : index
      %12 = vector.load %arg6[%c0_10, %c0_11] : memref<8x256xf32, #tpu.memory_space<vmem>>, vector<8x256xf32>
      %c0_12 = arith.constant 0 : index
      %c0_13 = arith.constant 0 : index
      %13 = vector.load %arg2[%c0_12, %c0_13] : memref<1x256xf32, #tpu.memory_space<vmem>>, vector<1x256xf32>
      %14 = vector.broadcast %13 : vector<1x256xf32> to vector<8x256xf32>
      %15 = arith.subf %12, %14 : vector<8x256xf32>
      %16 = vector.extract_strided_slice %15 {offsets = [0, 0], sizes = [8, 128], strides = [1, 1]} : vector<8x256xf32> to vector<8x128xf32>
      %17 = vector.extract_strided_slice %15 {offsets = [0, 128], sizes = [8, 128], strides = [1, 1]} : vector<8x256xf32> to vector<8x128xf32>
      %18 = arith.mulf %16, %16 : vector<8x128xf32>
      %19 = arith.mulf %17, %17 : vector<8x128xf32>
      %20 = arith.addf %18, %19 : vector<8x128xf32>
      %cst_14 = arith.constant dense<0.000000e+00> : vector<8xf32>
      %21 = vector.multi_reduction <add>, %20, %cst_14 [1] : vector<8x128xf32> to vector<8xf32>
      %22 = vector.shape_cast %21 : vector<8xf32> to vector<8x1xf32>
      %cst_15 = arith.constant 1.000000e-30 : f32
      %23 = vector.broadcast %cst_15 : f32 to vector<8x1xf32>
      %24 = arith.maximumf %22, %23 : vector<8x1xf32>
      %25 = tpu.reciprocal %24 {approx = true} : vector<8x1xf32> -> vector<8x1xf32>
      %26 = arith.mulf %24, %25 : vector<8x1xf32>
      %cst_16 = arith.constant 2.000000e+00 : f32
      %27 = vector.broadcast %cst_16 : f32 to vector<8x1xf32>
      %28 = arith.subf %27, %26 : vector<8x1xf32>
      %29 = arith.mulf %25, %28 : vector<8x1xf32>
      %30 = vector.broadcast %29 : vector<8x1xf32> to vector<8x128xf32>
      %31 = arith.mulf %20, %30 : vector<8x128xf32>
      %c0_17 = arith.constant 0 : index
      %c0_18 = arith.constant 0 : index
      %32 = vector.load %arg5[%c0_17, %c0_18] : memref<8x128xf32, #tpu.memory_space<vmem>>, vector<8x128xf32>
      tpu.vector_store %arg5[%c0_17, %c0_18], %31 {strides = array<i32>} : memref<8x128xf32, #tpu.memory_space<vmem>>, vector<8x128xf32>,
    } else {
    }
    return
  }
  func.func @transform_0(%arg0: i32, %arg1: i32) -> (i32, i32) {
    %c0_i32 = arith.constant 0 : i32
    %c0_i32_0 = arith.constant 0 : i32
    %c0_i32_1 = arith.constant 0 : i32
    return %c0_i32, %c0_i32_0 : i32, i32
  }
  func.func @transform_1(%arg0: i32, %arg1: i32) -> (i32, i32) {
    %c0_i32 = arith.constant 0 : i32
    return %arg0, %arg1 : i32, i32
  }
  func.func @transform_2(%arg0: i32, %arg1: i32) -> (i32, i32) {
    %c0_i32 = arith.constant 0 : i32
    %c0_i32_0 = arith.constant 0 : i32
    %c0_i32_1 = arith.constant 0 : i32
    return %c0_i32, %c0_i32_0 : i32, i32
  }
  func.func @transform_3(%arg0: i32, %arg1: i32) -> (i32, i32) {
    %c0_i32 = arith.constant 0 : i32
    %c0_i32_0 = arith.constant 0 : i32
    return %arg0, %c0_i32 : i32, i32
  }
}

</mosaic_0001>

<bundles_post_ra>
// kernel: tpu_custom_call.1
= control target key start
LH: loop header
LB: loop body
LE: loop exit
PB: predicated region body
PF: predicated region fallthrough
CT: control target
= control target key end

     0   :  { %8 = vsyncpa [#allocation4], 0  ;;  %s425_s0 = inlined_call_operand.hbm [shape: f32[1,256], index: 0, kind: input, shape index: {}]   ;;  %s426_s1 = inlined_call_operand.hbm [shape: f32[8,128], index: 1, kind: input, shape index: {}]   ;;  %s427_s2 = inlined_call_operand.hbm [shape: f32[128,256], index: 2, kind: input, shape index: {}]   ;;  %s428_s3 = inlined_call_operand.hbm [shape: f32[8,128], index: 3, kind: output, shape index: {}]  }
   0x1   :  { %9 = vsyncpa [#allocation7], 0 }
   0x2   :  { %10 = vsyncpa [#allocation5], 0  ;;  %s350_s12 = smov [#allocation6]   ;;  %s351_s14 = smov [#allocation3]  }
   0x3   :  { %s27_s13 = sshll.u32 %s350_s12, 4  ;;  %s17_s15 = sshll.u32 %s351_s14, 4  ;;  %s28_s13 = int_to_ptr.vmem [resolvable:$true] %s27_s13  ;;  %s18_s15 = int_to_ptr.vmem [resolvable:$true] %s17_s15 }
   0x4   :  { %s256_s18 = scalar_lea.hbm %s426_s1, 128 }
   0x5   :  { %p257_p0 = scmp.ne.s32.totalorder %s426_s1, %s256_s18  ;;  %p260_p1 = scmp.lt.u32.totalorder %s256_s18, %s426_s1 }
   0x7   :  { %p262_p2 = pnand %p260_p1, %p257_p0 }
   0x9   :  { %265 = shalt.err (!%p262_p2)
}
   0xa   :  { %s266_s23 = scalar_lea.vmem %s28_s13, 128  ;;  %p271_p4 = scmp.lt.s32.totalorder %s28_s13, %s28_s13 }
   0xb   :  { %p267_p3 = scmp.ne.s32.totalorder %s28_s13, %s266_s23  ;;  %p272_p5 = scmp.lt.s32.totalorder %s266_s23, %s266_s23 }
   0xd   :  { %p273_p6 = por %p272_p5, %p271_p4 }
   0xf   :  { %p274_p7 = pnand %p273_p6, %p267_p3 }
  0x11   :  { %277 = shalt.err (!%p274_p7)
}
  0x12   :  { %30 = dma.hbm_to_vmem [thread:$0]  %s426_s1, 128, %s28_s13, [#allocation7]  }
  0x13   :  { %s278_s28 = scalar_lea.hbm %s425_s0, 32 }
  0x14   :  { %p279_p8 = scmp.ne.s32.totalorder %s425_s0, %s278_s28  ;;  %p282_p9 = scmp.lt.u32.totalorder %s278_s28, %s425_s0 }
  0x16   :  { %p284_p10 = pnand %p282_p9, %p279_p8 }
  0x18   :  { %287 = shalt.err (!%p284_p10)
}
  0x19   :  { %s288_s6 = scalar_lea.vmem %s18_s15, 32  ;;  %p293_p12 = scmp.lt.s32.totalorder %s18_s15, %s18_s15 }
  0x1a   :  { %p289_p11 = scmp.ne.s32.totalorder %s18_s15, %s288_s6  ;;  %p294_p13 = scmp.lt.s32.totalorder %s288_s6, %s288_s6 }
  0x1c   :  { %p295_p0 = por %p294_p13, %p293_p12 }
  0x1e   :  { %p296_p1 = pnand %p295_p0, %p289_p11 }
  0x20   :  { %299 = shalt.err (!%p296_p1)
}
  0x21   :  { %20 = dma.hbm_to_vmem [thread:$0]  %s425_s0, 32, %s18_s15, [#allocation4]  }
  0x22   :  { %s352_s8 = smov [#allocation8]   ;;  %s300_s12 = scalar_lea.hbm %s427_s2, 4096 }
  0x23   :  { %s36_s9 = sshll.u32 %s352_s8, 4  ;;  %p301_p2 = scmp.ne.s32.totalorder %s427_s2, %s300_s12  ;;  %s37_s9 = int_to_ptr.vmem [resolvable:$true] %s36_s9 }
  0x24   :  { %p304_p3 = scmp.lt.u32.totalorder %s300_s12, %s427_s2 }
  0x26   :  { %p306_p4 = pnand %p304_p3, %p301_p2 }
  0x28   :  { %309 = shalt.err (!%p306_p4)
}
  0x29   :  { %s310_s18 = scalar_lea.vmem %s37_s9, 4096  ;;  %p315_p6 = scmp.lt.s32.totalorder %s37_s9, %s37_s9 }
  0x2a   :  { %p311_p5 = scmp.ne.s32.totalorder %s37_s9, %s310_s18  ;;  %p316_p7 = scmp.lt.s32.totalorder %s310_s18, %s310_s18 }
  0x2c   :  { %p317_p8 = por %p316_p7, %p315_p6 }
  0x2e   :  { %p318_p9 = pnand %p317_p8, %p311_p5 }
  0x30   :  { %321 = shalt.err (!%p318_p9)
}
  0x31   :  { %s353_s0 = smov 256   ;;  %s354_s15 = smov 16  }
  0x32   :  { %42 = dma.hbm_to_vmem [thread:$0]  %s427_s2, 4096, %s37_s9, [#allocation7], %s353_s0, %s353_s0, %s354_s15  }
  0x33   :  { %344 = dma.done.wait [#allocation4], 32  }
  0x34   :  { %345 = vsyncadd [#allocation4], 4294967264 }
  0x35   :  { %346 = dma.done.wait [#allocation7], 4224  }
  0x36   :  { %347 = vsyncadd [#allocation7], 4294963072  ;;  %v355_v0 = vmov 0.0   ;;  %v62_v1 = vld [vmem:[#allocation8 + $0x8] sm:$0xff]  ;;  %v64_v2 = vld [vmem:[#allocation8 + $0x18] sm:$0xff]  ;;  %v175_v50 = vlaneseq  ;;  %s356_s2 = smov [#allocation9]  }
  0x37   :  { %157 = vmatprep.mubr.f32.mxu0 %v355_v0  ;;  %v61_v3 = vld [vmem:[#allocation8] sm:$0xff]  ;;  %v215_v4 = vpack.c.bf16 %v64_v2, %v62_v1  ;;  %v63_v5 = vld [vmem:[#allocation8 + $0x10] sm:$0xff]  ;;  %v66_v6 = vld [vmem:[#allocation8 + $0x28] sm:$0xff]  ;;  %s205_s21 = sshll.u32 %s356_s2, 4  ;;  %s206_s21 = int_to_ptr.vmem [resolvable:$true] %s205_s21 }
  0x38   :  { %v68_v7 = vld [vmem:[#allocation8 + $0x38] sm:$0xff]  ;;  %v217_v8 = vpack.c.bf16 %v63_v5, %v61_v3  ;;  %v65_v10 = vld [vmem:[#allocation8 + $0x20] sm:$0xff]  ;;  %v67_v11 = vld [vmem:[#allocation8 + $0x30] sm:$0xff]  ;;  %v176_v51 = vshrl.u32 %v175_v50, 7  ;;  %s322_s22 = scalar_lea.vmem %s206_s21, 128  ;;  %p327_p11 = scmp.lt.s32.totalorder %s206_s21, %s206_s21 }
  0x39   :  { %v219_v9 = vpack.c.bf16 %v68_v7, %v66_v6  ;;  %v70_v12 = vld [vmem:[#allocation8 + $0x48] sm:$0xff]  ;;  %216 = vmatprep.subr.bf16.mxu0 %v215_v4  ;;  %v72_v13 = vld [vmem:[#allocation8 + $0x58] sm:$0xff]  ;;  %v221_v14 = vpack.c.bf16 %v67_v11, %v65_v10  ;;  %v69_v16 = vld [vmem:[#allocation8 + $0x40] sm:$0xff]  ;;  %p323_p10 = scmp.ne.s32.totalorder %s206_s21, %s322_s22  ;;  %p328_p12 = scmp.lt.s32.totalorder %s322_s22, %s322_s22 }
  0x3a   :  { %218 = vmatpush1.bf16.msra.mxu0 %v217_v8  ;;  %v223_v15 = vpack.c.bf16 %v72_v13, %v70_v12  ;;  %v71_v17 = vld [vmem:[#allocation8 + $0x50] sm:$0xff]  ;;  %v74_v18 = vld [vmem:[#allocation8 + $0x68] sm:$0xff]  ;;  %v76_v19 = vld [vmem:[#allocation8 + $0x78] sm:$0xff]  ;;  %v177_v52 = vsub.s32 0, %v176_v51  ;;  %v181_v54 = vsub.s32 1, %v176_v51 }
  0x3b   :  { %220 = vmatprep.subr.bf16.mxu0 %v219_v9  ;;  %v225_v20 = vpack.c.bf16 %v71_v17, %v69_v16  ;;  %v227_v21 = vpack.c.bf16 %v76_v19, %v74_v18  ;;  %v73_v22 = vld [vmem:[#allocation8 + $0x60] sm:$0xff]  ;;  %v75_v23 = vld [vmem:[#allocation8 + $0x70] sm:$0xff]  ;;  %v78_v24 = vld [vmem:[#allocation8 + $0x88] sm:$0xff]  ;;  %p329_p13 = por %p328_p12, %p327_p11 }
  0x3c   :  { %v80_v25 = vld [vmem:[#allocation8 + $0x98] sm:$0xff]  ;;  %v229_v26 = vpack.c.bf16 %v75_v23, %v73_v22  ;;  %v77_v28 = vld [vmem:[#allocation8 + $0x80] sm:$0xff]  ;;  %v79_v29 = vld [vmem:[#allocation8 + $0x90] sm:$0xff] }
  0x3d   :  { %v231_v27 = vpack.c.bf16 %v80_v25, %v78_v24  ;;  %v82_v30 = vld [vmem:[#allocation8 + $0xa8] sm:$0xff]  ;;  %v84_v31 = vld [vmem:[#allocation8 + $0xb8] sm:$0xff]  ;;  %v233_v32 = vpack.c.bf16 %v79_v29, %v77_v28  ;;  %v81_v34 = vld [vmem:[#allocation8 + $0xa0] sm:$0xff]  ;;  %p330_p0 = pnand %p329_p13, %p323_p10 }
  0x3e   :  { %222 = vmatpush1.bf16.msra.mxu0 %v221_v14  ;;  %v235_v33 = vpack.c.bf16 %v84_v31, %v82_v30  ;;  %v83_v35 = vld [vmem:[#allocation8 + $0xb0] sm:$0xff]  ;;  %v86_v36 = vld [vmem:[#allocation8 + $0xc8] sm:$0xff]  ;;  %v88_v37 = vld [vmem:[#allocation8 + $0xd8] sm:$0xff] }
  0x3f   :  { %224 = vmatprep.subr.bf16.mxu0 %v223_v15  ;;  %v237_v38 = vpack.c.bf16 %v83_v35, %v81_v34  ;;  %v239_v39 = vpack.c.bf16 %v88_v37, %v86_v36  ;;  %v85_v40 = vld [vmem:[#allocation8 + $0xc0] sm:$0xff]  ;;  %v87_v41 = vld [vmem:[#allocation8 + $0xd0] sm:$0xff]  ;;  %v90_v42 = vld [vmem:[#allocation8 + $0xe8] sm:$0xff] }
  0x40   :  { %v92_v43 = vld [vmem:[#allocation8 + $0xf8] sm:$0xff]  ;;  %v241_v44 = vpack.c.bf16 %v87_v41, %v85_v40  ;;  %v89_v46 = vld [vmem:[#allocation8 + $0xe0] sm:$0xff]  ;;  %v91_v47 = vld [vmem:[#allocation8 + $0xf0] sm:$0xff] }
  0x41   :  { %v243_v45 = vpack.c.bf16 %v92_v43, %v90_v42  ;;  %v245_v48 = vpack.c.bf16 %v91_v47, %v89_v46  ;;  %v60_v49 = vld [vmem:[#allocation6] sm:$0xff]  ;;  %v173_v53 = vld [vmem:[#allocation3] sm:$0x3] }
  0x42   :  { %226 = vmatpush1.bf16.msra.mxu0 %v225_v20  ;;  %v178_v55 = vrot.slane %v173_v53, %v177_v52  ;;  %v182_v56 = vrot.slane %v173_v53, %v181_v54 }
  0x43   :  { %228 = vmatprep.subr.bf16.mxu0 %v227_v21 }
  0x46   :  { %230 = vmatpush1.bf16.msra.mxu0 %v229_v26 }
  0x47   :  { %232 = vmatprep.subr.bf16.mxu0 %v231_v27 }
  0x4a   :  { %234 = vmatpush1.bf16.msra.mxu0 %v233_v32 }
  0x4b   :  { %236 = vmatprep.subr.bf16.mxu0 %v235_v33 }
  0x4e   :  { %238 = vmatpush1.bf16.msra.mxu0 %v237_v38 }
  0x4f   :  { %240 = vmatprep.subr.bf16.mxu0 %v239_v39 }
  0x52   :  { %242 = vmatpush1.bf16.msra.mxu0 %v241_v44 }
  0x53   :  { %244 = vmatprep.subr.bf16.mxu0 %v243_v45 }
  0x56   :  { %246 = vmatpush1.bf16.msra.mxu0 %v245_v48 }
  0x59   :  { %158 = vmatmul.mubr.f32.vlgmr.msra.gmra.mrb[0].mxu0 %v60_v49 }
 0x12c   :  { %v159_v57 = vpop.f32.mrb[0].mxu0 }
 0x12d   :  { %v185_v58 = vsub.f32 %v159_v57, %v178_v55  ;;  %v161_v59 = vpop.f32.mrb[1].mxu0 }
 0x12e   :  { %v186_v60 = vsub.f32 %v161_v59, %v182_v56 }
 0x12f   :  { %v187_v61 = vmul.f32 %v185_v58, %v185_v58 }
 0x130   :  { %v188_v62 = vmul.f32 %v186_v60, %v186_v60 }
 0x132   :  { %v189_v63 = vadd.f32 %v188_v62, %v187_v61 }
 0x134   :  { %190 = vadd.xlane.f32.xlu0 %v189_v63 }
 0x1c1   :  { %v191_v0 = vpop.xlane.xlu0 %190 }
 0x1c2   :  { %v192_v1 = vmax.f32 %v191_v0, 1e-30 }
 0x1c4   :  { %254 = vrcp.f32 %v192_v1 }
 0x1ce   :  { %v255_v2 = vpop.eup %254 }
 0x1cf   :  { %v194_v3 = vmul.f32 %v255_v2, %v192_v1 }
 0x1d1   :  { %v195_v4 = vsub.f32 2.0, %v194_v3 }
 0x1d3   :  { %v196_v5 = vmul.f32 %v255_v2, %v195_v4 }
 0x1d5   :  { %v197_v6 = vmul.f32 %v196_v5, %v189_v63 }
 0x1d7   :  { %198 = vst [vmem:[#allocation9] sm:$0xff] %v197_v6 }
 0x1d8   :  { %333 = shalt.err (!%p330_p0)
}
 0x1d9   :  { %s334_s25 = scalar_lea.hbm %s428_s3, 128 }
 0x1da   :  { %p335_p1 = scmp.ne.s32.totalorder %s428_s3, %s334_s25  ;;  %p338_p2 = scmp.lt.u32.totalorder %s334_s25, %s428_s3 }
 0x1dc   :  { %p340_p3 = pnand %p338_p2, %p335_p1 }
 0x1de   :  { %343 = shalt.err (!%p340_p3)
}
 0x1df   :  { %208 = dma.vmem_to_hbm [thread:$0]  %s206_s21, 128, %s428_s3, [#allocation5]  }
 0x1e0   :  { %348 = dma.done.wait [#allocation5], 128  }
 0x1e1   :  { %349 = vsyncadd [#allocation5], 4294967168 }
 0x1e2   :  { %212 = vsyncpa [#allocation4], 1 }
 0x1e3   :  { %213 = vsyncpa [#allocation7], 1 }
 0x1e4   :  { %214 = vsyncpa [#allocation5], 1 }

</bundles_post_ra>
